<compile_context>
chip_gen: v7x
topology: tpu7x:2x2x1
jax: 0.10.0
libtpu: 0.0.40
codegen_flags: <defaults>
</compile_context>

<pallas_src>
import functools

import jax
import jax.numpy as jnp
from jax.experimental import pallas as pl
from jax.experimental.pallas import tpu as pltpu
import numpy as np


def _conv_bn_relu_kernel(x_main_ref, x_halo0_ref, x_halo1_ref, w_ref, shift_ref, o_ref):
    # x_main_ref : (B_t, H_t, W+2, Cin) bf16  -- padded rows [h*H_t, h*H_t+H_t)
    # x_halo*_ref: (B_t, 1,   W+2, Cin) bf16  -- padded rows (h+1)*H_t and +1
    # w_ref      : (9*Cin, Cout)        bf16  -- BN scale folded into the taps
    # shift_ref  : (1, Cout)            f32   -- folded conv bias + BN shift
    # o_ref      : (B_t*H_t*W, Cout)          -- flat lane-dense output slab
    b_t, h_t, w_p2, cin = x_main_ref.shape
    w_out = w_p2 - 2
    rows, cout = o_ref.shape

    # Window including the 2-row halo; concat along a major axis is a cheap copy.
    win = jnp.concatenate(
        [x_main_ref[...], x_halo0_ref[...], x_halo1_ref[...]], axis=1)

    if cin < 128:
        # Small Cin: bf16 im2col (no f32 temp) -> single deep-K MXU matmul.
        taps = [win[:, kh:kh + h_t, kw:kw + w_out, :]
                for kh in range(3) for kw in range(3)]
        col = jnp.concatenate(taps, axis=-1).reshape(rows, 9 * cin)
        acc = jnp.dot(col, w_ref[...], preferred_element_type=jnp.float32)
    else:
        # Large Cin: nine accumulating K=Cin dots; no im2col temp at all.
        acc = jnp.zeros((rows, cout), jnp.float32)
        for t in range(9):
            kh, kw = divmod(t, 3)
            tap = win[:, kh:kh + h_t, kw:kw + w_out, :].reshape(rows, cin)
            acc = acc + jnp.dot(tap, w_ref[t * cin:(t + 1) * cin, :],
                                preferred_element_type=jnp.float32)

    o_ref[...] = jnp.maximum(acc + shift_ref[...], 0.0).astype(o_ref.dtype)


def _choose_tiles(N, H, W, Cin, Cout):
    """Pick (B_tile, H_tile).

    Targets ~512-2048 matmul rows (B_tile*H_tile*W) per grid step while keeping
    the per-step VMEM working set to a few MiB.  Invariant: B_tile == 1 or
    H_tile == H, which keeps each step's slice of the flattened (N*H*W, Cout)
    output contiguous.
    """
    # Rough per-output-row VMEM bytes: bf16 input + bf16 im2col + f32 acc/out.
    per_row = (W + 2) * Cin * 2 // max(W, 1) + 9 * Cin * 2 + 2 * Cout * 4
    max_rows = max(256, min(2048, (12 << 20) // max(per_row, 1)))

    rows_per_image = H * W
    if rows_per_image > max_rows:
        # Big image: split H into row tiles (halo handled by the BlockSpecs).
        cands = [d for d in range(1, H) if H % d == 0
                 and d * W <= max_rows and (d * W) % 8 == 0]
        # TODO(synk): pad H in the wrapper when it has no convenient divisor.
        return 1, (max(cands) if cands else H)

    # Small image: fold batch elements into one step to feed the MXU M dim...
    cands = [d for d in range(1, N + 1) if N % d == 0
             and d * rows_per_image <= max_rows
             and (d * rows_per_image) % 8 == 0]
    b_tile = max(cands) if cands else 1
    # ...but keep >= 2 grid steps when N >= 2 so both v7x TensorCores get work.
    if N >= 2 and b_tile >= N:
        smaller = [d for d in cands if d <= N // 2]
        if smaller:
            b_tile = max(smaller)
    return b_tile, H


@functools.partial(jax.jit, static_argnames=("eps",))
def single_conv_forward(x_nchw, weight, bias, gamma, beta,
                        running_mean, running_var, eps=1e-5):
    """Forward pass of single_conv.

    x_nchw: (N, Cin, H, W) float32
    weight: (Cout, Cin, 3, 3) float32  (PyTorch conv weight layout)
    bias, gamma, beta, running_mean, running_var: (Cout,)
    returns (N, Cout, H, W)
    """
    N, Cin, H, W = x_nchw.shape
    Cout = weight.shape[0]
    out_dtype = x_nchw.dtype

    b_tile, h_tile = _choose_tiles(N, H, W, Cin, Cout)
    rows_per_step = b_tile * h_tile * W
    n_b, n_h = N // b_tile, H // h_tile
    # Output row-block must be a multiple of 8 sublanes unless it spans the
    # whole flattened output; fall back to one full-extent step otherwise.
    if rows_per_step % 8 != 0 and n_b * n_h > 1:
        b_tile, h_tile = N, H
        rows_per_step = N * H * W
        n_b = n_h = 1

    # --- glue: layout conversion + parameter folding (plain JAX) ---
    x_nhwc = jnp.transpose(x_nchw, (0, 2, 3, 1)).astype(jnp.bfloat16)
    x_pad = jnp.pad(x_nhwc, ((0, 0), (1, 1), (1, 1), (0, 0)))   # (N, H+2, W+2, Cin) bf16

    inv_std = jax.lax.rsqrt(running_var.astype(jnp.float32) + eps)
    scale = gamma * inv_std                                     # (Cout,)
    shift = (bias - running_mean) * scale + beta                # (Cout,)

    # (Cout, Cin, 3, 3) -> (3, 3, Cin, Cout) -> (9*Cin, Cout); fold BN scale in.
    w_taps = jnp.transpose(weight, (2, 3, 1, 0)).reshape(9 * Cin, Cout)
    w_taps = (w_taps * scale[None, :]).astype(jnp.bfloat16)
    shift_2d = shift.reshape(1, Cout).astype(jnp.float32)

    # VMEM budget: tile footprint x double buffering, capped well under v7x's 64 MiB.
    step_bytes = (
        2 * b_tile * (h_tile + 2) * (W + 2) * Cin * 2        # main + halo blocks (x2 buffers)
        + 2 * (9 * Cin * Cout * 2 + Cout * 4)                # weight + shift (x2 buffers)
        + 2 * rows_per_step * Cout * 4                       # output block (x2 buffers)
        + b_tile * (h_tile + 2) * (W + 2) * Cin * 2          # win concat temp
        + rows_per_step * 9 * Cin * 2                        # im2col temp (small-Cin path)
        + 2 * rows_per_step * Cout * 4                       # f32 acc + epilogue temp
    )
    vmem_limit = int(min(48 << 20, max(32 << 20, 2 * step_bytes)))

    flops = 2 * N * H * W * Cout * 9 * Cin
    bytes_accessed = int(N * (H + 2) * (W + 2) * Cin * 2
                         + 9 * Cin * Cout * 2 + Cout * 4
                         + N * H * W * Cout * out_dtype.itemsize)

    out_flat = pl.pallas_call(
        _conv_bn_relu_kernel,
        out_shape=jax.ShapeDtypeStruct((N * H * W, Cout), out_dtype),
        grid_spec=pltpu.PrefetchScalarGridSpec(
            num_scalar_prefetch=0,
            grid=(n_b, n_h),
            in_specs=[
                # Main H_tile-row window of the padded input.
                pl.BlockSpec((b_tile, h_tile, W + 2, Cin),
                             lambda b, h: (b, h, 0, 0)),
                # 2-row halo below the tile: same array again, two single-row
                # blocks (block size 1 on H => index is the padded row index).
                pl.BlockSpec((b_tile, 1, W + 2, Cin),
                             lambda b, h: (b, (h + 1) * h_tile, 0, 0)),
                pl.BlockSpec((b_tile, 1, W + 2, Cin),
                             lambda b, h: (b, (h + 1) * h_tile + 1, 0, 0)),
                # Weights / shift: constant across the grid.
                pl.BlockSpec((9 * Cin, Cout), lambda b, h: (0, 0)),
                pl.BlockSpec((1, Cout), lambda b, h: (0, 0)),
            ],
            out_specs=pl.BlockSpec((rows_per_step, Cout),
                                   lambda b, h: (b * n_h + h, 0)),
        ),
        compiler_params=pltpu.CompilerParams(
            dimension_semantics=("parallel", "parallel"),
            vmem_limit_bytes=vmem_limit,
        ),
        cost_estimate=pl.CostEstimate(
            flops=int(flops), transcendentals=0, bytes_accessed=bytes_accessed),
    )(x_pad, x_pad, x_pad, w_taps, shift_2d)

    out_nhwc = out_flat.reshape(N, H, W, Cout)      # free metadata reshape
    return jnp.transpose(out_nhwc, (0, 3, 1, 2))    # back to NCHW (module interface)


def _reference_forward(x_nchw, weight, bias, gamma, beta,
                       running_mean, running_var, eps=1e-5):
    """Pure-JAX f32 reference (lax conv) for correctness check."""
    y = jax.lax.conv_general_dilated(
        x_nchw, weight, window_strides=(1, 1), padding=((1, 1), (1, 1)),
        dimension_numbers=("NCHW", "OIHW", "NCHW"),
    )
    y = y + bias.reshape(1, -1, 1, 1)
    inv_std = jax.lax.rsqrt(running_var + eps)
    y = (y - running_mean.reshape(1, -1, 1, 1)) * (gamma * inv_std).reshape(1, -1, 1, 1)
    y = y + beta.reshape(1, -1, 1, 1)
    return jnp.maximum(y, 0.0)


if __name__ == "__main__":
    key = jax.random.PRNGKey(0)
    N, Cin, Cout, H, W = 2, 4, 8, 16, 16

    k_x, k_w, k_b, k_g, k_beta = jax.random.split(key, 5)
    x = jax.random.normal(k_x, (N, Cin, H, W), dtype=jnp.float32)

    # Deterministic synthetic parameter init.
    fan_in = Cin * 3 * 3
    bound = 1.0 / np.sqrt(fan_in)
    weight = jax.random.uniform(k_w, (Cout, Cin, 3, 3), jnp.float32, -bound, bound)
    bias = jax.random.uniform(k_b, (Cout,), jnp.float32, -bound, bound)
    gamma = 1.0 + 0.1 * jax.random.normal(k_g, (Cout,), jnp.float32)
    beta = 0.1 * jax.random.normal(k_beta, (Cout,), jnp.float32)
    running_mean = jnp.zeros((Cout,), jnp.float32)
    running_var = jnp.ones((Cout,), jnp.float32)

    out = single_conv_forward(x, weight, bias, gamma, beta,
                              running_mean, running_var)
    out = jax.block_until_ready(out)

    ref = _reference_forward(x, weight, bias, gamma, beta,
                             running_mean, running_var)
    # Kernel uses bf16 activations/weights with f32 MXU accumulation; compare
    # against the f32 reference with a correspondingly relaxed tolerance.
    np.testing.assert_allclose(np.asarray(out), np.asarray(ref),
                               rtol=5e-2, atol=5e-2)
    print("KERNEL_OK")
</pallas_src>

<mosaic_0001>
module attributes {stable_mosaic.version = 11 : i64} {
  func.func @_conv_bn_relu_kernel(%arg0: i32, %arg1: i32, %arg2: memref<1x16x18x4xbf16, #tpu.memory_space<vmem>>, %arg3: memref<1x1x18x4xbf16, #tpu.memory_space<vmem>>, %arg4: memref<1x1x18x4xbf16, #tpu.memory_space<vmem>>, %arg5: memref<36x8xbf16, #tpu.memory_space<vmem>>, %arg6: memref<1x8xf32, #tpu.memory_space<vmem>>, %arg7: memref<256x8xf32, #tpu.memory_space<vmem>>) attributes {dimension_semantics = [#tpu.dimension_semantics<parallel>, #tpu.dimension_semantics<parallel>], iteration_bounds = array<i64: 2, 1>, scalar_prefetch = 0 : i64, scratch_operands = 0 : i64, tpu.core_type = #tpu.core_type<tc>, window_params = [{transform_indices = @transform_0, window_bounds = array<i64: 1, 16, 18, 4>}, {transform_indices = @transform_1, window_bounds = array<i64: 1, 1, 18, 4>}, {transform_indices = @transform_2, window_bounds = array<i64: 1, 1, 18, 4>}, {pipeline_mode = #tpu.pipeline_mode<synchronous>, transform_indices = @transform_3, window_bounds = array<i64: 36, 8>}, {pipeline_mode = #tpu.pipeline_mode<synchronous>, transform_indices = @transform_4, window_bounds = array<i64: 1, 8>}, {transform_indices = @transform_5, window_bounds = array<i64: 256, 8>}]} {
    %c0 = arith.constant 0 : index
    %c0_0 = arith.constant 0 : index
    %c0_1 = arith.constant 0 : index
    %c0_2 = arith.constant 0 : index
    %0 = vector.load %arg2[%c0, %c0_0, %c0_1, %c0_2] : memref<1x16x18x4xbf16, #tpu.memory_space<vmem>>, vector<1x16x18x4xbf16>
    %c0_3 = arith.constant 0 : index
    %c0_4 = arith.constant 0 : index
    %c0_5 = arith.constant 0 : index
    %c0_6 = arith.constant 0 : index
    %1 = vector.load %arg3[%c0_3, %c0_4, %c0_5, %c0_6] : memref<1x1x18x4xbf16, #tpu.memory_space<vmem>>, vector<1x1x18x4xbf16>
    %c0_7 = arith.constant 0 : index
    %c0_8 = arith.constant 0 : index
    %c0_9 = arith.constant 0 : index
    %c0_10 = arith.constant 0 : index
    %2 = vector.load %arg4[%c0_7, %c0_8, %c0_9, %c0_10] : memref<1x1x18x4xbf16, #tpu.memory_space<vmem>>, vector<1x1x18x4xbf16>
    %3 = tpu.concatenate %0, %1, %2 in 1 : vector<1x16x18x4xbf16>, vector<1x1x18x4xbf16>, vector<1x1x18x4xbf16> -> vector<1x18x18x4xbf16>
    %4 = vector.extract_strided_slice %3 {offsets = [0, 0, 0, 0], sizes = [1, 16, 16, 4], strides = [1, 1, 1, 1]} : vector<1x18x18x4xbf16> to vector<1x16x16x4xbf16>
    %5 = vector.extract_strided_slice %3 {offsets = [0, 0, 1, 0], sizes = [1, 16, 16, 4], strides = [1, 1, 1, 1]} : vector<1x18x18x4xbf16> to vector<1x16x16x4xbf16>
    %6 = vector.extract_strided_slice %3 {offsets = [0, 0, 2, 0], sizes = [1, 16, 16, 4], strides = [1, 1, 1, 1]} : vector<1x18x18x4xbf16> to vector<1x16x16x4xbf16>
    %7 = vector.extract_strided_slice %3 {offsets = [0, 1, 0, 0], sizes = [1, 16, 16, 4], strides = [1, 1, 1, 1]} : vector<1x18x18x4xbf16> to vector<1x16x16x4xbf16>
    %8 = vector.extract_strided_slice %3 {offsets = [0, 1, 1, 0], sizes = [1, 16, 16, 4], strides = [1, 1, 1, 1]} : vector<1x18x18x4xbf16> to vector<1x16x16x4xbf16>
    %9 = vector.extract_strided_slice %3 {offsets = [0, 1, 2, 0], sizes = [1, 16, 16, 4], strides = [1, 1, 1, 1]} : vector<1x18x18x4xbf16> to vector<1x16x16x4xbf16>
    %10 = vector.extract_strided_slice %3 {offsets = [0, 2, 0, 0], sizes = [1, 16, 16, 4], strides = [1, 1, 1, 1]} : vector<1x18x18x4xbf16> to vector<1x16x16x4xbf16>
    %11 = vector.extract_strided_slice %3 {offsets = [0, 2, 1, 0], sizes = [1, 16, 16, 4], strides = [1, 1, 1, 1]} : vector<1x18x18x4xbf16> to vector<1x16x16x4xbf16>
    %12 = vector.extract_strided_slice %3 {offsets = [0, 2, 2, 0], sizes = [1, 16, 16, 4], strides = [1, 1, 1, 1]} : vector<1x18x18x4xbf16> to vector<1x16x16x4xbf16>
    %13 = tpu.concatenate %4, %5, %6, %7, %8, %9, %10, %11, %12 in 3 : vector<1x16x16x4xbf16>, vector<1x16x16x4xbf16>, vector<1x16x16x4xbf16>, vector<1x16x16x4xbf16>, vector<1x16x16x4xbf16>, vector<1x16x16x4xbf16>, vector<1x16x16x4xbf16>, vector<1x16x16x4xbf16>, vector<1x16x16x4xbf16> -> vector<1x16x16x36xbf16>
    %14 = vector.shape_cast %13 : vector<1x16x16x36xbf16> to vector<256x36xbf16>
    %c0_11 = arith.constant 0 : index
    %c0_12 = arith.constant 0 : index
    %15 = vector.load %arg5[%c0_11, %c0_12] : memref<36x8xbf16, #tpu.memory_space<vmem>>, vector<36x8xbf16>
    %cst = arith.constant dense<0.000000e+00> : vector<256x8xf32>
    %16 = tpu.matmul %14, %15, %cst {dimension_numbers = #tpu.dot_dimension_numbers<[1], [0], [0], [1], [0, 0, 1, 1], [], []>} : vector<256x36xbf16>, vector<36x8xbf16>, vector<256x8xf32> -> vector<256x8xf32>
    %c0_13 = arith.constant 0 : index
    %c0_14 = arith.constant 0 : index
    %17 = vector.load %arg6[%c0_13, %c0_14] : memref<1x8xf32, #tpu.memory_space<vmem>>, vector<1x8xf32>
    %18 = vector.broadcast %17 : vector<1x8xf32> to vector<256x8xf32>
    %19 = arith.addf %16, %18 : vector<256x8xf32>
    %cst_15 = arith.constant 0.000000e+00 : f32
    %20 = vector.broadcast %cst_15 : f32 to vector<256x8xf32>
    %21 = arith.maximumf %19, %20 : vector<256x8xf32>
    %c0_16 = arith.constant 0 : index
    %c0_17 = arith.constant 0 : index
    %22 = vector.load %arg7[%c0_16, %c0_17] : memref<256x8xf32, #tpu.memory_space<vmem>>, vector<256x8xf32>
    tpu.vector_store %arg7[%c0_16, %c0_17], %21 {strides = array<i32>} : memref<256x8xf32, #tpu.memory_space<vmem>>, vector<256x8xf32>,
    return
  }
  func.func @transform_0(%arg0: i32, %arg1: i32) -> (i32, i32, i32, i32) {
    %c0_i32 = arith.constant 0 : i32
    %c0_i32_0 = arith.constant 0 : i32
    %c0_i32_1 = arith.constant 0 : i32
    return %arg0, %arg1, %c0_i32, %c0_i32_0 : i32, i32, i32, i32
  }
  func.func @transform_1(%arg0: i32, %arg1: i32) -> (i32, i32, i32, i32) {
    %c1_i32 = arith.constant 1 : i32
    %0 = arith.addi %arg1, %c1_i32 : i32
    %c16_i32 = arith.constant 16 : i32
    %1 = arith.muli %0, %c16_i32 : i32
    %c0_i32 = arith.constant 0 : i32
    %c0_i32_0 = arith.constant 0 : i32
    %c0_i32_1 = arith.constant 0 : i32
    return %arg0, %1, %c0_i32, %c0_i32_0 : i32, i32, i32, i32
  }
  func.func @transform_2(%arg0: i32, %arg1: i32) -> (i32, i32, i32, i32) {
    %c1_i32 = arith.constant 1 : i32
    %0 = arith.addi %arg1, %c1_i32 : i32
    %c16_i32 = arith.constant 16 : i32
    %1 = arith.muli %0, %c16_i32 : i32
    %c1_i32_0 = arith.constant 1 : i32
    %2 = arith.addi %1, %c1_i32_0 : i32
    %c0_i32 = arith.constant 0 : i32
    %c0_i32_1 = arith.constant 0 : i32
    %c0_i32_2 = arith.constant 0 : i32
    return %arg0, %2, %c0_i32, %c0_i32_1 : i32, i32, i32, i32
  }
  func.func @transform_3(%arg0: i32, %arg1: i32) -> (i32, i32) {
    %c0_i32 = arith.constant 0 : i32
    %c0_i32_0 = arith.constant 0 : i32
    %c0_i32_1 = arith.constant 0 : i32
    return %c0_i32, %c0_i32_0 : i32, i32
  }
  func.func @transform_4(%arg0: i32, %arg1: i32) -> (i32, i32) {
    %c0_i32 = arith.constant 0 : i32
    %c0_i32_0 = arith.constant 0 : i32
    %c0_i32_1 = arith.constant 0 : i32
    return %c0_i32, %c0_i32_0 : i32, i32
  }
  func.func @transform_5(%arg0: i32, %arg1: i32) -> (i32, i32) {
    %c1_i32 = arith.constant 1 : i32
    %0 = arith.muli %arg0, %c1_i32 : i32
    %1 = arith.addi %0, %arg1 : i32
    %c0_i32 = arith.constant 0 : i32
    %c0_i32_0 = arith.constant 0 : i32
    return %1, %c0_i32 : i32, i32
  }
}

</mosaic_0001>

<bundles_post_ra>
// kernel: single_conv_forward.1
= control target key start
LH: loop header
LB: loop body
LE: loop exit
PB: predicated region body
PF: predicated region fallthrough
CT: control target
= control target key end

     0   :  { %s2064_s18 = smov 0   ;;  %s2066_s19 = smov 0   ;;  %s2890_s0 = inlined_call_operand.vmem [shape: bf16[2,18,18,4], index: 0, kind: input, shape index: {}, may-alias: {0,1,2}]   ;;  %s2891_s1 = inlined_call_operand.vmem [shape: bf16[2,18,18,4], index: 1, kind: input, shape index: {}, may-alias: {0,1,2}]   ;;  %s2892_s2 = inlined_call_operand.vmem [shape: bf16[2,18,18,4], index: 2, kind: input, shape index: {}, may-alias: {0,1,2}]   ;;  %s2893_s3 = inlined_call_operand.vmem [shape: bf16[36,8], index: 3, kind: input, shape index: {}]   ;;  %s2894_s4 = inlined_call_operand.vmem [shape: f32[1,8], index: 4, kind: input, shape index: {}]   ;;  %s2895_s5 = inlined_call_operand.vmem [shape: f32[512,8], index: 5, kind: output, shape index: {}]  }
   0x1   :  { %s2068_s20 = smov 0  }
   0x2 LB: > { %s27_s21 = sadd.s32 1, %s2020_s19  ;;  %p1793_p0 = scmp.ge.s32.totalorder %s2024_s20, 1  ;;  %s2024_s20 = sphi %s2068_s20, %s15_s20   ;;  %s2020_s19 = sphi %s2066_s19, %s2897_s19   ;;  %s2016_s18 = sphi %s2064_s18, %s2896_s18  }
   0x3   : > { %p29_p1 = scmp.ge.s32.totalorder %s27_s21, 2  ;;  %p271_p2 = scmp.lt.s32.totalorder %s2024_s20, 3 }
   0x5   : > { %s2899_s21 = smov (%p29_p1, %s27_s21), 0  ;;  %p272_p3 = pnand %p1793_p0, %p271_p2 }
   0x6   : > { %p339_p4 = scmp.lt.s32.totalorder (!%p272_p3), %s2016_s18, 1  ;;  %vm798_vm0 = vcmask (!%p272_p3), 1046528   ;;  %s2026_s27 = smov (!%p272_p3), 12   ;;  %vm573_vm1 = vsmask.f32 (!%p272_p3), 7424  ;;  %vm1441_vm2 = vcmask (!%p272_p3), 1041408  }
   0x7   : > { %275 = sbr.rel (%p272_p3) target bundleno = 609 (0x261), region = 40  ;;  %s2027_s28 = smov (!%p272_p3), 8   ;;  %vm1117_vm3 = vcmask (!%p272_p3), 31744   ;;  %vm1150_vm4 = vcmask (!%p272_p3), 64512   ;;  %vm1216_vm5 = vcmask (!%p272_p3), 130048   ;;  %vm1183_vm6 = vcmask (!%p272_p3), 97280  }
   0x8   : > { %s2028_s29 = smov (!%p272_p3), 4   ;;  %s2029_s30 = smov (!%p272_p3), 16   ;;  %vm1249_vm7 = vcmask (!%p272_p3), 162816   ;;  %vm1282_vm8 = vcmask (!%p272_p3), 195584   ;;  %vm1315_vm9 = vcmask (!%p272_p3), 228352   ;;  %vm1348_vm10 = vcmask (!%p272_p3), 261120  }
   0x9   : > { %s2030_s6 = smov (!%p272_p3), 20   ;;  %s2031_s7 = smov (!%p272_p3), 24   ;;  %vm1408_vm11 = vcmask (!%p272_p3), 293888  }
   0xa   : > { %s2032_s12 = smov (!%p272_p3), 28   ;;  %s2033_s15 = smov (!%p272_p3), 32  }
   0xe   : > { %s340_s22 = scalar_select %p339_p4, %s2016_s18, 1 }
  0x10   : > { %s2086_s23 = smul.u32 216, %s340_s22 }
  0x12   : > { %s2092_s26 = scalar_lea.vmem %s2890_s0, %s2086_s23  ;;  %s1858_s16 = sadd.s32 192, %s2086_s23 }
  0x13   : > { %v2095_v0 = vld [vmem:[%s2092_s26 + $0x6c] sm:$0xff]   ;;  %v2105_v2 = vld [vmem:[%s2092_s26 + $0x60] sm:$0xff]   ;;  %v1964_v3 = vld [vmem:[%s2092_s26 + $0x68] ss:$0 sps:$4 sm:$0x11]   ;;  %s2277_s24 = scalar_lea.vmem %s2891_s1, %s1858_s16  ;;  %s1860_s25 = sadd.s32 204, %s2086_s23 }
  0x14   : > { %v2098_v1 = vld [vmem:[%s2092_s26 + $0xc] sm:$0xff]   ;;  %900 = vrot.lane.b32.xlu1 %v2095_v0, %s2026_s27  ;;  %v2109_v4 = vld [vmem:[%s2092_s26] sm:$0xff]   ;;  %v826_v5 = vrot.slane %v2095_v0, 1  ;;  %v823_v6 = vrot.slane %v2105_v2, 1  ;;  %v824_v7 = vrot.slane %v1964_v3, 1  ;;  %v683_v26 = vshrl.u32 %v2095_v0, 16  ;;  %s2317_s10 = scalar_lea.vmem %s2892_s2, %s1860_s25 }
  0x15   : > { %884 = vrot.lane.b32.xlu0 %v2098_v1, %s2026_s27  ;;  %v1966_v8 = vld [vmem:[%s2092_s26 + $0x8] ss:$0 sps:$4 sm:$0x11]   ;;  %v802_v9 = vrot.slane %v2098_v1, 1  ;;  %v799_v10 = vrot.slane %v2109_v4, 1  ;;  %v587_v16 = vshrl.u32 %v2098_v1, 16 }
  0x16   : > { %v1967_v11 = vld [vmem:[%s2092_s26 + $0x74] ss:$0 sps:$4 sm:$0x11]   ;;  %v2118_v12 = vsel %vm798_vm0, %v823_v6, %v824_v7  ;;  %v800_v13 = vrot.slane %v1966_v8, 1  ;;  %v589_v17 = vshll.u32 %v2098_v1, 16  ;;  %v575_v18 = vshrl.u32 %v2109_v4, 16 }
  0x17   : > { %v1968_v14 = vld [vmem:[%s2092_s26 + $0x14] ss:$0 sps:$4 sm:$0x11]   ;;  %v827_v15 = vrot.slane %v1967_v11, 1  ;;  %v577_v22 = vshll.u32 %v2109_v4, 16  ;;  %v582_v25 = vshll.u32 %v1966_v8, 16 }
  0x18   : > { %863 = vrot.lane.b32.xlu1 %v2118_v12, %s2027_s28  ;;  %v801_v19 = vsel %vm798_vm0, %v799_v10, %v800_v13  ;;  %v803_v20 = vrot.slane %v1968_v14, 1  ;;  %v594_v21 = vshll.u32 %v1968_v14, 16  ;;  %v591_v24 = vrot.slane %v589_v17, 1  ;;  %v2140_v39 = vld [vmem:[%s2092_s26 + $0x78] sm:$0xff]   ;;  %v2198_v14 = vld [vmem:[%s2092_s26 + $0x24] sm:$0xff]   ;;  %s1797_s23 = sshll.u32 %s2016_s18, 5 }
  0x19   : > { %847 = vrot.lane.b32.xlu0 %v801_v19, %s2027_s28  ;;  %v2130_v23 = vsel %vm798_vm0, %v826_v5, %v827_v15  ;;  %v579_v29 = vrot.slane %v577_v22, 1  ;;  %v685_v30 = vshll.u32 %v2095_v0, 16  ;;  %v584_v32 = vrot.slane %v582_v25, 1  ;;  %v2146_v46 = vld [vmem:[%s2092_s26 + $0x18] sm:$0xff]   ;;  %v1989_v19 = vld [vmem:[%s2893_s3] sm:$0xff]   ;;  %p384_p5 = scmp.lt.s32.totalorder %s1797_s23, 63 }
  0x1a   : > { %v804_v27 = vsel %vm798_vm0, %v802_v9, %v803_v20  ;;  %v596_v28 = vrot.slane %v594_v21, 1  ;;  %v592_v31 = vor.u32 %v591_v24, %v587_v16  ;;  %v690_v33 = vshll.u32 %v1967_v11, 16  ;;  %v1971_v47 = vld [vmem:[%s2092_s26 + $0x80] ss:$0 sps:$4 sm:$0x11]   ;;  %v2191_v11 = vld [vmem:[%s2092_s26 + $0x84] sm:$0xff]   ;;  %1880 = vmatprep.subr.bf16.mxu0 %v1989_v19  ;;  %1918 = vmatprep.subr.bf16.mxu1 %v1989_v19 }
  0x1b   : > { %v671_v34 = vshrl.u32 %v2105_v2, 16  ;;  %v580_v35 = vor.u32 %v579_v29, %v575_v18  ;;  %v687_v36 = vrot.slane %v685_v30, 1  ;;  %v673_v37 = vshll.u32 %v2105_v2, 16  ;;  %v1972_v52 = vld [vmem:[%s2092_s26 + $0x20] ss:$0 sps:$4 sm:$0x11]   ;;  %1881 = vmatpush3.bf16.msra.mxu0 %v1989_v19  ;;  %1921 = vmatpush3.bf16.msra.mxu1 %v1989_v19 }
  0x1c   : > { %865 = vrot.lane.b32.xlu1 %v2130_v23, %s2027_s28  ;;  %v678_v38 = vshll.u32 %v1964_v3, 16  ;;  %v597_v40 = vsel %vm573_vm1, %v592_v31, %v596_v28  ;;  %v692_v41 = vrot.slane %v690_v33, 1  ;;  %v697_v50 = vshll.u32 %v2140_v39, 16  ;;  %v1975_v15 = vld [vmem:[%s2092_s26 + $0x8c] ss:$0 sps:$4 sm:$0x11]  }
  0x1d   : > { %849 = vrot.lane.b32.xlu0 %v804_v27, %s2027_s28  ;;  %v585_v42 = vsel %vm573_vm1, %v580_v35, %v584_v32  ;;  %v688_v43 = vor.u32 %v687_v36, %v683_v26  ;;  %v675_v44 = vrot.slane %v673_v37, 1  ;;  %v601_v53 = vshll.u32 %v2146_v46, 16  ;;  %v1976_v17 = vld [vmem:[%s2092_s26 + $0x2c] ss:$0 sps:$4 sm:$0x11]   ;;  %s2901_s23 = smov (!%p384_p5, %s1797_s23), 63 }
  0x1e   : > { %v680_v45 = vrot.slane %v678_v38, 1  ;;  %v695_v54 = vshrl.u32 %v2140_v39, 16  ;;  %v699_v55 = vrot.slane %v697_v50, 1  ;;  %v702_v56 = vshll.u32 %v1971_v47, 16 }
  0x1f   : > { %v2151_v48 = vsel %vm573_vm1, %v688_v43, %v692_v41  ;;  %v676_v49 = vor.u32 %v675_v44, %v671_v34  ;;  %v599_v57 = vshrl.u32 %v2146_v46, 16  ;;  %v603_v58 = vrot.slane %v601_v53, 1  ;;  %v1993_v32 = vld [vmem:[%s2893_s3 + $0x10] ss:$0 sps:$4 sm:$0x33]  }
  0x20   : > { %768 = vrot.lane.b32.xlu1 %v597_v40, %s2028_s29  ;;  %v606_v59 = vshll.u32 %v1972_v52, 16  ;;  %v700_v60 = vor.u32 %v699_v55, %v695_v54  ;;  %v704_v61 = vrot.slane %v702_v56, 1  ;;  %v829_v6 = vrot.slane %v2140_v39, 1  ;;  %v2254_v43 = vld [vmem:[%s2092_s26 + $0x90] sm:$0xff]  }
  0x21   : > { %766 = vrot.lane.b32.xlu0 %v585_v42, %s2028_s29  ;;  %v2156_v51 = vsel %vm573_vm1, %v676_v49, %v680_v45  ;;  %v604_v62 = vor.u32 %v603_v58, %v599_v57  ;;  %v830_v7 = vrot.slane %v1971_v47, 1  ;;  %v805_v8 = vrot.slane %v2146_v46, 1  ;;  %v2259_v44 = vld [vmem:[%s2092_s26 + $0x30] sm:$0xff]   ;;  %v1979_v45 = vld [vmem:[%s2092_s26 + $0x98] ss:$0 sps:$4 sm:$0x11]  }
  0x22   : > { %v608_v63 = vrot.slane %v606_v59, 1  ;;  %v2173_v3 = vsel %vm573_vm1, %v700_v60, %v704_v61  ;;  %v806_v9 = vrot.slane %v1972_v52, 1  ;;  %v709_v16 = vshll.u32 %v2191_v11, 16  ;;  %v1980_v49 = vld [vmem:[%s2092_s26 + $0x38] ss:$0 sps:$4 sm:$0x11]  }
  0x23   : > { %v2188_v10 = vsel %vm798_vm0, %v829_v6, %v830_v7  ;;  %v613_v18 = vshll.u32 %v2198_v14, 16  ;;  %v707_v20 = vshrl.u32 %v2191_v11, 16  ;;  %v714_v22 = vshll.u32 %v1975_v15, 16 }
  0x24   : > { %784 = vrot.lane.b32.xlu1 %v2151_v48, %s2028_s29  ;;  %v2177_v5 = vsel %vm573_vm1, %v604_v62, %v608_v63  ;;  %v2195_v13 = vsel %vm798_vm0, %v805_v8, %v806_v9  ;;  %v711_v21 = vrot.slane %v709_v16, 1  ;;  %v611_v24 = vshrl.u32 %v2198_v14, 16  ;;  %v2294_v9 = vld [vmem:[%s2092_s26 + $0x9c] sm:$0xff]  }
  0x25   : > { %782 = vrot.lane.b32.xlu0 %v2156_v51, %s2028_s29  ;;  %v615_v25 = vrot.slane %v613_v18, 1  ;;  %v618_v26 = vshll.u32 %v1976_v17, 16  ;;  %v716_v29 = vrot.slane %v714_v22, 1  ;;  %v1443_v34 = vsel %vm1441_vm2, %v1993_v32, 0 }
  0x26   : > { %v712_v28 = vor.u32 %v711_v21, %v707_v20  ;;  %v832_v36 = vrot.slane %v2191_v11, 1  ;;  %v833_v37 = vrot.slane %v1975_v15, 1  ;;  %v808_v38 = vrot.slane %v2198_v14, 1  ;;  %v1983_v15 = vld [vmem:[%s2092_s26 + $0xa4] ss:$0 sps:$4 sm:$0x11]  }
  0x27   : > { %v616_v30 = vor.u32 %v615_v25, %v611_v24  ;;  %v620_v31 = vrot.slane %v618_v26, 1  ;;  %v721_v47 = vshll.u32 %v2254_v43, 16  ;;  %v625_v50 = vshll.u32 %v2259_v44, 16 }
  0x28   : > { %902 = vrot.lane.b32.xlu1 %v2140_v39, %s2026_s27  ;;  %v717_v33 = vsel %vm573_vm1, %v712_v28, %v716_v29  ;;  %v834_v41 = vsel %vm798_vm0, %v832_v36, %v833_v37  ;;  %v719_v52 = vshrl.u32 %v2254_v43, 16  ;;  %v726_v54 = vshll.u32 %v1979_v45, 16 }
  0x29   : > { %886 = vrot.lane.b32.xlu0 %v2146_v46, %s2026_s27  ;;  %v621_v35 = vsel %vm573_vm1, %v616_v30, %v620_v31  ;;  %v723_v53 = vrot.slane %v721_v47, 1  ;;  %v623_v55 = vshrl.u32 %v2259_v44, 16  ;;  %v627_v56 = vrot.slane %v625_v50, 1 }
  0x2a   : > { %v630_v57 = vshll.u32 %v1980_v49, 16  ;;  %v728_v59 = vrot.slane %v726_v54, 1  ;;  %v811_v6 = vrot.slane %v2259_v44, 1  ;;  %v812_v7 = vrot.slane %v1980_v49, 1 }
  0x2b   : > { %v724_v58 = vor.u32 %v723_v53, %v719_v52  ;;  %v628_v60 = vor.u32 %v627_v56, %v623_v55  ;;  %v733_v16 = vshll.u32 %v2294_v9, 16  ;;  %v731_v19 = vshrl.u32 %v2294_v9, 16  ;;  %v2366_v56 = vld [vmem:[%s2092_s26 + $0xa8] sm:$0xff]  }
  0x2c   : > { %947 = vrot.lane.b32.xlu1 %v2151_v48, %s2029_s30  ;;  %v632_v61 = vrot.slane %v630_v57, 1  ;;  %v738_v21 = vshll.u32 %v1983_v15, 16  ;;  %v838_v36 = vrot.slane %v2294_v9, 1  ;;  %v839_v37 = vrot.slane %v1983_v15, 1 }
  0x2d   : > { %931 = vrot.lane.b32.xlu0 %v597_v40, %s2029_s30  ;;  %v809_v40 = vrot.slane %v1976_v17, 1  ;;  %v729_v62 = vsel %vm573_vm1, %v724_v58, %v728_v59  ;;  %v1984_v17 = vld [vmem:[%s2092_s26 + $0x44] ss:$0 sps:$4 sm:$0x11]   ;;  %v735_v20 = vrot.slane %v733_v16, 1  ;;  %v2372_v58 = vld [vmem:[%s2092_s26 + $0x48] sm:$0xff]  }
  0x2e   : > { %v633_v63 = vsel %vm573_vm1, %v628_v60, %v632_v61  ;;  %v642_v25 = vshll.u32 %v1984_v17, 16  ;;  %v1987_v60 = vld [vmem:[%s2092_s26 + $0xb0] ss:$0 sps:$4 sm:$0x11]   ;;  %v745_v61 = vshll.u32 %v2366_v56, 16  ;;  %v647_v15 = vshrl.u32 %v2372_v58, 16 }
  0x2f   : > { %v810_v42 = vsel %vm798_vm0, %v808_v38, %v809_v40  ;;  %v736_v26 = vor.u32 %v735_v20, %v731_v19 }
  0x30   : > { %949 = vrot.lane.b32.xlu1 %v2173_v3, %s2029_s30  ;;  %v644_v29 = vrot.slane %v642_v25, 1 }
  0x31   : > { %933 = vrot.lane.b32.xlu0 %v2177_v5, %s2029_s30 }
  0x34   : > { %982 = vrot.lane.b32.xlu1 %v2130_v23, %s2030_s6 }
  0x35   : > { %966 = vrot.lane.b32.xlu0 %v804_v27, %s2030_s6  ;;  %v1990_v27 = vld [vmem:[%s2893_s3 + $0x8] sm:$0xff]  }
  0x36   : > { %1882 = vmatprep.subr.bf16.mxu0 %v1990_v27  ;;  %1919 = vmatprep.subr.bf16.mxu1 %v1990_v27 }
  0x37   : > { %1883 = vmatpush3.bf16.msra.mxu0 %v1990_v27  ;;  %1922 = vmatpush3.bf16.msra.mxu1 %v1990_v27  ;;  %v740_v27 = vrot.slane %v738_v21, 1 }
  0x38   : > { %984 = vrot.lane.b32.xlu1 %v2188_v10, %s2030_s6  ;;  %1924 = vmatprep.subr.msk.bf16.mxu0 %vm1441_vm2, %v1993_v32 }
  0x39   : > { %968 = vrot.lane.b32.xlu0 %v2195_v13, %s2030_s6  ;;  %1925 = vmatprep.subr.msk.bf16.mxu1 %vm1441_vm2, %v1993_v32  ;;  %v741_v31 = vsel %vm573_vm1, %v736_v26, %v740_v27 }
  0x3b   : > { %1885 = vmatpush3.bf16.msra.mxu0 %v1443_v34  ;;  %1923 = vmatpush3.bf16.msra.mxu1 %v1443_v34 }
  0x3c   : > { %1019 = vrot.lane.b32.xlu1 %v2140_v39, %s2031_s7 }
  0x3d   : > { %1003 = vrot.lane.b32.xlu0 %v2146_v46, %s2031_s7 }
  0x40   : > { %1021 = vrot.lane.b32.xlu1 %v2191_v11, %s2031_s7 }
  0x41   : > { %1005 = vrot.lane.b32.xlu0 %v2198_v14, %s2031_s7 }
  0x44   : > { %1066 = vrot.lane.b32.xlu1 %v2173_v3, %s2032_s12 }
  0x45   : > { %1050 = vrot.lane.b32.xlu0 %v2177_v5, %s2032_s12 }
  0x48   : > { %1068 = vrot.lane.b32.xlu1 %v717_v33, %s2032_s12 }
  0x49   : > { %1052 = vrot.lane.b32.xlu0 %v621_v35, %s2032_s12 }
  0x4c   : > { %1101 = vrot.lane.b32.xlu1 %v2188_v10, %s2033_s15 }
  0x4d   : > { %1085 = vrot.lane.b32.xlu0 %v2195_v13, %s2033_s15 }
  0x50   : > { %786 = vrot.lane.b32.xlu1 %v2173_v3, %s2028_s29  ;;  %v835_v3 = vrot.slane %v2254_v43, 1 }
  0x51   : > { %770 = vrot.lane.b32.xlu0 %v2177_v5, %s2028_s29  ;;  %v836_v5 = vrot.slane %v1979_v45, 1  ;;  %v840_v45 = vsel %vm798_vm0, %v838_v36, %v839_v37  ;;  %v841_v36 = vrot.slane %v2366_v56, 1  ;;  %v842_v37 = vrot.slane %v1987_v60, 1 }
  0x53   : > { %v837_v8 = vsel %vm798_vm0, %v835_v3, %v836_v5  ;;  %v649_v3 = vshll.u32 %v2372_v58, 16 }
  0x54   : > { %1103 = vrot.lane.b32.xlu1 %v834_v41, %s2033_s15 }
  0x55   : > { %1087 = vrot.lane.b32.xlu0 %v810_v42, %s2033_s15  ;;  %v651_v16 = vrot.slane %v649_v3, 1  ;;  %v2428_v3 = vld [vmem:[%s2092_s26 + $0xb4] sm:$0xff]  }
  0x58   : > { %788 = vrot.lane.b32.xlu1 %v717_v33, %s2028_s29 }
  0x59   : > { %772 = vrot.lane.b32.xlu0 %v621_v35, %s2028_s29 }
  0x5c   : > { %867 = vrot.lane.b32.xlu1 %v2188_v10, %s2027_s28  ;;  %v813_v10 = vsel %vm798_vm0, %v811_v6, %v812_v7  ;;  %v743_v6 = vshrl.u32 %v2366_v56, 16  ;;  %v747_v7 = vrot.slane %v745_v61, 1 }
  0x5d   : > { %851 = vrot.lane.b32.xlu0 %v2195_v13, %s2027_s28  ;;  %v2299_v13 = vld [vmem:[%s2092_s26 + $0x3c] sm:$0xff]  }
  0x5e   : > { %v637_v18 = vshll.u32 %v2299_v13, 16  ;;  %v635_v22 = vshrl.u32 %v2299_v13, 16  ;;  %v814_v40 = vrot.slane %v2299_v13, 1  ;;  %v748_v19 = vor.u32 %v747_v7, %v743_v6 }
  0x60   : > { %869 = vrot.lane.b32.xlu1 %v834_v41, %s2027_s28  ;;  %v639_v24 = vrot.slane %v637_v18, 1 }
  0x61   : > { %853 = vrot.lane.b32.xlu0 %v810_v42, %s2027_s28 }
  0x62   : > { %v640_v28 = vor.u32 %v639_v24, %v635_v22  ;;  %v652_v22 = vor.u32 %v651_v16, %v647_v15 }
  0x64   : > { %904 = vrot.lane.b32.xlu1 %v2191_v11, %s2026_s27 }
  0x65   : > { %888 = vrot.lane.b32.xlu0 %v2198_v14, %s2026_s27 }
  0x68   : > { %906 = vrot.lane.b32.xlu1 %v2254_v43, %s2026_s27 }
  0x69   : > { %890 = vrot.lane.b32.xlu0 %v2259_v44, %s2026_s27 }
  0x6c   : > { %951 = vrot.lane.b32.xlu1 %v717_v33, %s2029_s30  ;;  %v645_v33 = vsel %vm573_vm1, %v640_v28, %v644_v29 }
  0x6d   : > { %935 = vrot.lane.b32.xlu0 %v621_v35, %s2029_s30 }
  0x70   : > { %953 = vrot.lane.b32.xlu1 %v729_v62, %s2029_s30 }
  0x71   : > { %937 = vrot.lane.b32.xlu0 %v633_v63, %s2029_s30 }
  0x74   : > { %986 = vrot.lane.b32.xlu1 %v834_v41, %s2030_s6  ;;  %v815_v41 = vrot.slane %v1984_v17, 1 }
  0x75   : > { %970 = vrot.lane.b32.xlu0 %v810_v42, %s2030_s6 }
  0x76   : > { %v2351_v49 = vsel %vm798_vm0, %v814_v40, %v815_v41 }
  0x78   : > { %988 = vrot.lane.b32.xlu1 %v837_v8, %s2030_s6 }
  0x79   : > { %972 = vrot.lane.b32.xlu0 %v813_v10, %s2030_s6 }
  0x7c   : > { %1023 = vrot.lane.b32.xlu1 %v2254_v43, %s2031_s7 }
  0x7d   : > { %1007 = vrot.lane.b32.xlu0 %v2259_v44, %s2031_s7 }
  0x80   : > { %1025 = vrot.lane.b32.xlu1 %v2294_v9, %s2031_s7 }
  0x81   : > { %1009 = vrot.lane.b32.xlu0 %v2299_v13, %s2031_s7 }
  0x84   : > { %1070 = vrot.lane.b32.xlu1 %v729_v62, %s2032_s12 }
  0x85   : > { %1054 = vrot.lane.b32.xlu0 %v633_v63, %s2032_s12 }
  0x86   : > { %v2324_v30 = vpop.permute.xlu1 %900 }
  0x87   : > { %v2328_v32 = vpop.permute.xlu0 %884 }
  0x88   : > { %1072 = vrot.lane.b32.xlu1 %v741_v31, %s2032_s12 }
  0x89   : > { %1056 = vrot.lane.b32.xlu0 %v645_v33, %s2032_s12 }
  0x8a   : > { %v2333_v34 = vpop.permute.xlu1 %863 }
  0x8b   : > { %v2335_v35 = vpop.permute.xlu0 %847 }
  0x8c   : > { %1105 = vrot.lane.b32.xlu1 %v837_v8, %s2033_s15 }
  0x8d   : > { %1089 = vrot.lane.b32.xlu0 %v813_v10, %s2033_s15 }
  0x8e   : > { %v2340_v38 = vpop.permute.xlu1 %865 }
  0x8f   : > { %v2343_v42 = vpop.permute.xlu0 %849 }
  0x90   : > { %790 = vrot.lane.b32.xlu1 %v729_v62, %s2028_s29 }
  0x91   : > { %774 = vrot.lane.b32.xlu0 %v633_v63, %s2028_s29  ;;  %v1988_v63 = vld [vmem:[%s2092_s26 + $0x50] ss:$0 sps:$4 sm:$0x11]  }
  0x92   : > { %v2348_v47 = vpop.permute.xlu1 %768  ;;  %v654_v17 = vshll.u32 %v1988_v63, 16  ;;  %v818_v40 = vrot.slane %v1988_v63, 1 }
  0x93   : > { %v767_v50 = vpop.permute.xlu0 %766 }
  0x94   : > { %1107 = vrot.lane.b32.xlu1 %v840_v45, %s2033_s15  ;;  %v656_v24 = vrot.slane %v654_v17, 1  ;;  %v1119_v6 = vsel %vm1117_vm3, %v2109_v4, %v767_v50 }
  0x95   : > { %1091 = vrot.lane.b32.xlu0 %v2351_v49, %s2033_s15  ;;  %v1152_v4 = vsel %vm1150_vm4, %v1119_v6, %v2335_v35  ;;  %v2457_v35 = vld [vmem:[%s2092_s26 + $0x5c] ss:$0 sps:$4 sm:$0x11]  }
  0x96   : > { %v2356_v52 = vpop.permute.xlu1 %784  ;;  %v2409_v28 = vsel %vm573_vm1, %v652_v22, %v656_v24  ;;  %v755_v22 = vshrl.u32 %v2428_v3, 16 }
  0x97   : > { %v783_v53 = vpop.permute.xlu0 %782 }
  0x98   : > { %792 = vrot.lane.b32.xlu1 %v741_v31, %s2028_s29  ;;  %v1135_v41 = vsel %vm1117_vm3, %v2105_v2, %v783_v53 }
  0x99   : > { %776 = vrot.lane.b32.xlu0 %v645_v33, %s2028_s29  ;;  %v1168_v53 = vsel %vm1150_vm4, %v1135_v41, %v2333_v34  ;;  %v757_v34 = vshll.u32 %v2428_v3, 16 }
  0x9a   : > { %v2360_v54 = vpop.permute.xlu1 %902  ;;  %v1201_v50 = vsel %vm1183_vm6, %v1168_v53, %v2324_v30  ;;  %v666_v53 = vshll.u32 %v2457_v35, 16 }
  0x9b   : > { %v2362_v55 = vpop.permute.xlu0 %886 }
  0x9c   : > { %871 = vrot.lane.b32.xlu1 %v837_v8, %s2027_s28  ;;  %v750_v8 = vshll.u32 %v1987_v60, 16  ;;  %v2425_v60 = vsel %vm798_vm0, %v841_v36, %v842_v37  ;;  %v759_v36 = vrot.slane %v757_v34, 1 }
  0x9d   : > { %855 = vrot.lane.b32.xlu0 %v813_v10, %s2027_s28 }
  0x9e   : > { %v2369_v57 = vpop.permute.xlu1 %947  ;;  %v752_v20 = vrot.slane %v750_v8, 1 }
  0x9f   : > { %v2374_v59 = vpop.permute.xlu0 %931  ;;  %v1234_v16 = vsel %vm1216_vm5, %v1201_v50, %v2369_v57 }
  0xa0   : > { %873 = vrot.lane.b32.xlu1 %v840_v45, %s2027_s28  ;;  %v2405_v26 = vsel %vm573_vm1, %v748_v19, %v752_v20  ;;  %v1185_v19 = vsel %vm1183_vm6, %v1152_v4, %v2328_v32  ;;  %v1137_v32 = vsel %vm1117_vm3, %v2095_v0, %v2356_v52  ;;  %v1121_v0 = vsel %vm1117_vm3, %v2098_v1, %v2348_v47 }
  0xa1   : > { %857 = vrot.lane.b32.xlu0 %v2351_v49, %s2027_s28  ;;  %v1218_v57 = vsel %vm1216_vm5, %v1185_v19, %v2374_v59  ;;  %v760_v4 = vor.u32 %v759_v36, %v755_v22  ;;  %v1154_v47 = vsel %vm1150_vm4, %v1121_v0, %v2343_v42 }
  0xa2   : > { %v2381_v62 = vpop.permute.xlu1 %949 }
  0xa3   : > { %v2385_v5 = vpop.permute.xlu0 %933 }
  0xa4   : > { %908 = vrot.lane.b32.xlu1 %v2294_v9, %s2026_s27 }
  0xa5   : > { %892 = vrot.lane.b32.xlu0 %v2299_v13, %s2026_s27 }
  0xa6   : > { %v983_v10 = vpop.permute.xlu1 %982 }
  0xa7   : > { %v2393_v18 = vpop.permute.xlu0 %966  ;;  %v1267_v20 = vsel %vm1249_vm7, %v1234_v16, %v983_v10  ;;  %v668_v16 = vrot.slane %v666_v53, 1  ;;  %v1996_v53 = vld [vmem:[%s2277_s24] sm:$0xff]  }
  0xa8   : > { %910 = vrot.lane.b32.xlu1 %v2366_v56, %s2026_s27  ;;  %v1251_v10 = vsel %vm1249_vm7, %v1218_v57, %v2393_v18 }
  0xa9   : > { %894 = vrot.lane.b32.xlu0 %v2372_v58, %s2026_s27 }
  0xaa   : > { %v2399_v21 = vpop.permute.xlu1 %984 }
  0xab   : > { %v2401_v25 = vpop.permute.xlu0 %968 }
  0xac   : > { %955 = vrot.lane.b32.xlu1 %v741_v31, %s2029_s30 }
  0xad   : > { %939 = vrot.lane.b32.xlu0 %v645_v33, %s2029_s30  ;;  %v817_v33 = vrot.slane %v2372_v58, 1 }
  0xae   : > { %v1020_v27 = vpop.permute.xlu1 %1019 }
  0xaf   : > { %v1004_v29 = vpop.permute.xlu0 %1003  ;;  %v2437_v7 = vsel %vm798_vm0, %v817_v33, %v818_v40  ;;  %v1300_v24 = vsel %vm1282_vm8, %v1267_v20, %v1020_v27 }
  0xb0   : > { %957 = vrot.lane.b32.xlu1 %v2405_v26, %s2029_s30  ;;  %v1284_v27 = vsel %vm1282_vm8, %v1251_v10, %v1004_v29  ;;  %v1170_v29 = vsel %vm1150_vm4, %v1137_v32, %v2340_v38 }
  0xb1   : > { %941 = vrot.lane.b32.xlu0 %v2409_v28, %s2029_s30  ;;  %v1203_v50 = vsel %vm1183_vm6, %v1170_v29, %v2360_v54  ;;  %v922_v29 = vshll.u32 %v1996_v53, 16 }
  0xb2   : > { %v2416_v31 = vpop.permute.xlu1 %1021  ;;  %v1236_v38 = vsel %vm1216_vm5, %v1203_v50, %v2381_v62 }
  0xb3   : > { %v2421_v61 = vpop.permute.xlu0 %1005  ;;  %v1269_v54 = vsel %vm1249_vm7, %v1236_v38, %v2399_v21 }
  0xb4   : > { %990 = vrot.lane.b32.xlu1 %v840_v45, %s2030_s6  ;;  %v2440_v45 = vld [vmem:[%s2092_s26 + $0x54] sm:$0xff]   ;;  %v1302_v42 = vsel %vm1282_vm8, %v1269_v54, %v2416_v31 }
  0xb5   : > { %974 = vrot.lane.b32.xlu0 %v2351_v49, %s2030_s6  ;;  %v2447_v49 = vld [vmem:[%s2092_s26 + $0xbc] ss:$0 sps:$4 sm:$0x11]   ;;  %v661_v17 = vshll.u32 %v2440_v45, 16  ;;  %v659_v59 = vshrl.u32 %v2440_v45, 16  ;;  %v820_v10 = vrot.slane %v2440_v45, 1 }
  0xb6   : > { %v1067_v63 = vpop.permute.xlu1 %1066  ;;  %v762_v37 = vshll.u32 %v2447_v49, 16 }
  0xb7   : > { %v1051_v8 = vpop.permute.xlu0 %1050  ;;  %v1333_v33 = vsel %vm1315_vm9, %v1300_v24, %v1067_v63  ;;  %v663_v6 = vrot.slane %v661_v17, 1  ;;  %v1187_v17 = vsel %vm1183_vm6, %v1154_v47, %v2362_v55 }
  0xb8   : > { %992 = vrot.lane.b32.xlu1 %v2425_v60, %s2030_s6  ;;  %v1317_v52 = vsel %vm1315_vm9, %v1284_v27, %v1051_v8  ;;  %v764_v34 = vrot.slane %v762_v37, 1  ;;  %v1220_v20 = vsel %vm1216_vm5, %v1187_v17, %v2385_v5  ;;  %v845_v37 = vrot.slane %v2447_v49, 1 }
  0xb9   : > { %976 = vrot.lane.b32.xlu0 %v2437_v7, %s2030_s6  ;;  %v664_v8 = vor.u32 %v663_v6, %v659_v59  ;;  %v1253_v22 = vsel %vm1249_vm7, %v1220_v20, %v2401_v25 }
  0xba   : > { %v1069_v15 = vpop.permute.xlu1 %1068  ;;  %v765_v62 = vsel %vm573_vm1, %v760_v4, %v764_v34  ;;  %v1286_v57 = vsel %vm1282_vm8, %v1253_v22, %v2421_v61  ;;  %v924_v34 = vrot.slane %v922_v29, 1  ;;  %v963_v22 = vrot.slane %v1996_v53, 1 }
  0xbb   : > { %v1053_v30 = vpop.permute.xlu0 %1052  ;;  %v1335_v55 = vsel %vm1315_vm9, %v1302_v42, %v1069_v15  ;;  %v669_v5 = vsel %vm573_vm1, %v664_v8, %v668_v16 }
  0xbc   : > { %1027 = vrot.lane.b32.xlu1 %v2366_v56, %s2031_s7  ;;  %v1319_v31 = vsel %vm1315_vm9, %v1286_v57, %v1053_v30  ;;  %v844_v30 = vrot.slane %v2428_v3, 1  ;;  %v2602_v57 = vld [vmem:[%s2317_s10] sm:$0xff]  }
  0xbd   : > { %1011 = vrot.lane.b32.xlu0 %v2372_v58, %s2031_s7 }
  0xbe   : > { %v1102_v40 = vpop.permute.xlu1 %1101  ;;  %v846_v59 = vsel %vm798_vm0, %v844_v30, %v845_v37  ;;  %v1041_v30 = vshll.u32 %v2602_v57, 16 }
  0xbf   : > { %v1366_v41 = vsel %vm1348_vm10, %v1333_v33, %v1102_v40  ;;  %v1086_v18 = vpop.permute.xlu0 %1085  ;;  %v821_v33 = vrot.slane %v2457_v35, 1 }
  0xc0   : > { %1029 = vrot.lane.b32.xlu1 %v2428_v3, %s2031_s7  ;;  %1902 = vmatprep.mubr.msk.bf16.mxu1 %vm1408_vm11, %v1366_v41  ;;  %v1350_v63 = vsel %vm1348_vm10, %v1317_v52, %v1086_v18  ;;  %v1997_v18 = vld [vmem:[%s2277_s24 + $0x8] ss:$0 sps:$4 sm:$0x11]  }
  0xc1   : > { %1013 = vrot.lane.b32.xlu0 %v2440_v45, %s2031_s7  ;;  %1886 = vmatprep.mubr.msk.bf16.mxu0 %vm1408_vm11, %v1350_v63  ;;  %v822_v27 = vsel %vm798_vm0, %v820_v10, %v821_v33  ;;  %v927_v50 = vshll.u32 %v1997_v18, 16 }
  0xc2   : > { %v2497_v1 = vpop.permute.xlu1 %786 }
  0xc3   : > { %v2507_v19 = vpop.permute.xlu0 %770  ;;  %v929_v8 = vrot.slane %v927_v50, 1 }
  0xc4   : > { %1074 = vrot.lane.b32.xlu1 %v2405_v26, %s2032_s12  ;;  %v1123_v37 = vsel %vm1117_vm3, %v2146_v46, %v2507_v19  ;;  %v1039_v46 = vshrl.u32 %v2602_v57, 16 }
  0xc5   : > { %1058 = vrot.lane.b32.xlu0 %v2409_v28, %s2032_s12 }
  0xc6   : > { %v1104_v21 = vpop.permute.xlu1 %1103 }
  0xc7   : > { %v1368_v24 = vsel %vm1348_vm10, %v1335_v55, %v1104_v21  ;;  %v1088_v36 = vpop.permute.xlu0 %1087 }
  0xc8   : > { %1076 = vrot.lane.b32.xlu1 %v765_v62, %s2032_s12  ;;  %1903 = vmatmul.mubr.msk.bf16.vlgmr.msra.gmra.mrb[0].mxu1 %vm1408_vm11, %v1368_v24  ;;  %v1352_v25 = vsel %vm1348_vm10, %v1319_v31, %v1088_v36 }
  0xc9   : > { %1060 = vrot.lane.b32.xlu0 %v669_v5, %s2032_s12  ;;  %1887 = vmatmul.mubr.msk.bf16.vlgmr.msra.gmra.mrb[0].mxu0 %vm1408_vm11, %v1352_v25  ;;  %v2612_v25 = vld [vmem:[%s2317_s10 + $0x8] ss:$0 sps:$4 sm:$0x11]  }
  0xca   : > { %v2531_v15 = vpop.permute.xlu1 %788  ;;  %v1046_v29 = vshll.u32 %v2612_v25, 16 }
  0xcb   : > { %v2533_v61 = vpop.permute.xlu0 %772 }
  0xcc   : > { %1109 = vrot.lane.b32.xlu1 %v2425_v60, %s2033_s15 }
  0xcd   : > { %1093 = vrot.lane.b32.xlu0 %v2437_v7, %s2033_s15 }
  0xce   : > { %v868_v32 = vpop.permute.xlu1 %867 }
  0xcf   : > { %v2543_v40 = vpop.permute.xlu0 %851 }
  0xd0   : > { %794 = vrot.lane.b32.xlu1 %v2405_v26, %s2028_s29 }
  0xd1   : > { %778 = vrot.lane.b32.xlu0 %v2409_v28, %s2028_s29 }
  0xd2   : > { %v2550_v49 = vpop.permute.xlu1 %869 }
  0xd3   : > { %v2553_v41 = vpop.permute.xlu0 %853 }
  0xd4   : > { %1111 = vrot.lane.b32.xlu1 %v846_v59, %s2033_s15 }
  0xd5   : > { %1095 = vrot.lane.b32.xlu0 %v822_v27, %s2033_s15 }
  0xd6   : > { %v905_v35 = vpop.permute.xlu1 %904 }
  0xd7   : > { %v889_v6 = vpop.permute.xlu0 %888 }
  0xd8   : > { %796 = vrot.lane.b32.xlu1 %v765_v62, %s2028_s29 }
  0xd9   : > { %780 = vrot.lane.b32.xlu0 %v669_v5, %s2028_s29 }
  0xda   : > { %v2559_v26 = vpop.permute.xlu1 %906 }
  0xdb   : > { %v2561_v28 = vpop.permute.xlu0 %890 }
  0xdc   : > { %875 = vrot.lane.b32.xlu1 %v2425_v60, %s2027_s28  ;;  %v920_v60 = vshrl.u32 %v1996_v53, 16 }
  0xdd   : > { %859 = vrot.lane.b32.xlu0 %v2437_v7, %s2027_s28 }
  0xde   : > { %v952_v0 = vpop.permute.xlu1 %951  ;;  %v925_v38 = vor.u32 %v924_v34, %v920_v60  ;;  %v2000_v60 = vld [vmem:[%s2092_s26 + $0x60] sm:$0xff]  }
  0xdf   : > { %v936_v52 = vpop.permute.xlu0 %935 }
  0xe0   : > { %877 = vrot.lane.b32.xlu1 %v846_v59, %s2027_s28  ;;  %v2588_v54 = vsel %vm573_vm1, %v925_v38, %v929_v8 }
  0xe1   : > { %861 = vrot.lane.b32.xlu0 %v822_v27, %s2027_s28  ;;  %s1798_s28 = sshll.u32 %s2901_s23, 3 }
  0xe2   : > { %v2571_v63 = vpop.permute.xlu1 %953 }
  0xe3   : > { %v2573_v4 = vpop.permute.xlu0 %937 }
  0xe4   : > { %912 = vrot.lane.b32.xlu1 %v2428_v3, %s2026_s27 }
  0xe5   : > { %896 = vrot.lane.b32.xlu0 %v2440_v45, %s2026_s27 }
  0xe6   : > { %v987_v7 = vpop.permute.xlu1 %986 }
  0xe7   : > { %v971_v47 = vpop.permute.xlu0 %970 }
  0xe8   : > { %914 = vrot.lane.b32.xlu1 %v1996_v53, %s2026_s27 }
  0xe9   : > { %898 = vrot.lane.b32.xlu0 %v2105_v2, %s2026_s27  ;;  %v964_v2 = vrot.slane %v1997_v18, 1  ;;  %v1043_v18 = vrot.slane %v1041_v30, 1  ;;  %v1083_v30 = vrot.slane %v2612_v25, 1 }
  0xea   : > { %v2582_v16 = vpop.permute.xlu1 %988 }
  0xeb   : > { %v2584_v17 = vpop.permute.xlu0 %972  ;;  %v1044_v8 = vor.u32 %v1043_v18, %v1039_v46 }
  0xec   : > { %959 = vrot.lane.b32.xlu1 %v765_v62, %s2029_s30  ;;  %v2599_v62 = vsel %vm798_vm0, %v963_v22, %v964_v2 }
  0xed   : > { %943 = vrot.lane.b32.xlu0 %v669_v5, %s2029_s30  ;;  %v1139_v5 = vsel %vm1117_vm3, %v2140_v39, %v2497_v1  ;;  %v1156_v1 = vsel %vm1150_vm4, %v1123_v37, %v2543_v40 }
  0xee   : > { %v1024_v20 = vpop.permute.xlu1 %1023  ;;  %v1172_v36 = vsel %vm1150_vm4, %v1139_v5, %v868_v32  ;;  %v1189_v33 = vsel %vm1183_vm6, %v1156_v1, %v889_v6 }
  0xef   : > { %v1008_v42 = vpop.permute.xlu0 %1007  ;;  %v1205_v10 = vsel %vm1183_vm6, %v1172_v36, %v905_v35  ;;  %v1222_v19 = vsel %vm1216_vm5, %v1189_v33, %v936_v52  ;;  %v1141_v52 = vsel %vm1117_vm3, %v2191_v11, %v2531_v15  ;;  %v2001_v15 = vld [vmem:[%s2092_s26 + $0x6c] sm:$0xff]  }
  0xf0   : > { %961 = vrot.lane.b32.xlu1 %v2588_v54, %s2029_s30  ;;  %v1238_v32 = vsel %vm1216_vm5, %v1205_v10, %v952_v0  ;;  %v1255_v40 = vsel %vm1249_vm7, %v1222_v19, %v971_v47  ;;  %v1174_v47 = vsel %vm1150_vm4, %v1141_v52, %v2550_v49 }
  0xf1   : > { %945 = vrot.lane.b32.xlu0 %v2156_v51, %s2029_s30  ;;  %v1207_v11 = vsel %vm1183_vm6, %v1174_v47, %v2559_v26 }
  0xf2   : > { %v1026_v55 = vpop.permute.xlu1 %1025  ;;  %v1240_v2 = vsel %vm1216_vm5, %v1207_v11, %v2571_v63 }
  0xf3   : > { %v2595_v21 = vpop.permute.xlu0 %1009 }
  0xf4   : > { %994 = vrot.lane.b32.xlu1 %v846_v59, %s2030_s6  ;;  %v1271_v59 = vsel %vm1249_vm7, %v1238_v32, %v987_v7 }
  0xf5   : > { %978 = vrot.lane.b32.xlu0 %v822_v27, %s2030_s6  ;;  %v1304_v35 = vsel %vm1282_vm8, %v1271_v59, %v1024_v20  ;;  %v1048_v20 = vrot.slane %v1046_v29, 1 }
  0xf6   : > { %v1071_v24 = vpop.permute.xlu1 %1070 }
  0xf7   : > { %v1055_v31 = vpop.permute.xlu0 %1054  ;;  %v1337_v0 = vsel %vm1315_vm9, %v1304_v35, %v1071_v24 }
  0xf8   : > { %996 = vrot.lane.b32.xlu1 %v2599_v62, %s2030_s6 }
  0xf9   : > { %980 = vrot.lane.b32.xlu0 %v2118_v12, %s2030_s6  ;;  %s2784_s6 = scalar_lea.vmem %s2895_s5, %s1798_s28 }
  0xfa   : > { %v1073_v39 = vpop.permute.xlu1 %1072 }
  0xfb   : > { %v1057_v27 = vpop.permute.xlu0 %1056 }
  0xfc   : > { %1031 = vrot.lane.b32.xlu1 %v1996_v53, %s2031_s7  ;;  %v1288_v53 = vsel %vm1282_vm8, %v1255_v40, %v1008_v42  ;;  %v1125_v42 = vsel %vm1117_vm3, %v2198_v14, %v2533_v61  ;;  %v1273_v14 = vsel %vm1249_vm7, %v1240_v2, %v2582_v16 }
  0xfd   : > { %1015 = vrot.lane.b32.xlu0 %v2000_v60, %s2031_s7  ;;  %v1321_v50 = vsel %vm1315_vm9, %v1288_v53, %v1055_v31  ;;  %v1158_v49 = vsel %vm1150_vm4, %v1125_v42, %v2553_v41  ;;  %v1306_v5 = vsel %vm1282_vm8, %v1273_v14, %v1026_v55  ;;  %v1049_v41 = vsel %vm573_vm1, %v1044_v8, %v1048_v20 }
  0xfe   : > { %v1106_v6 = vpop.permute.xlu1 %1105  ;;  %v1191_v24 = vsel %vm1183_vm6, %v1158_v49, %v2561_v28  ;;  %v1339_v31 = vsel %vm1315_vm9, %v1306_v5, %v1073_v39  ;;  %v1082_v55 = vrot.slane %v2602_v57, 1 }
  0xff   : > { %v1370_v34 = vsel %vm1348_vm10, %v1337_v0, %v1106_v6  ;;  %v1090_v7 = vpop.permute.xlu0 %1089  ;;  %v1224_v26 = vsel %vm1216_vm5, %v1191_v24, %v2573_v4 }
 0x100   : > { %1033 = vrot.lane.b32.xlu1 %v2602_v57, %s2031_s7  ;;  %1906 = vmatprep.mubr.msk.bf16.mxu1 %vm1408_vm11, %v1370_v34  ;;  %v1354_v38 = vsel %vm1348_vm10, %v1321_v50, %v1090_v7  ;;  %v1257_v63 = vsel %vm1249_vm7, %v1224_v26, %v2584_v17  ;;  %v1084_v37 = vsel %vm798_vm0, %v1082_v55, %v1083_v30 }
 0x101   : > { %1017 = vrot.lane.b32.xlu0 %v2001_v15, %s2031_s7  ;;  %1890 = vmatprep.mubr.msk.bf16.mxu0 %vm1408_vm11, %v1354_v38  ;;  %v1290_v16 = vsel %vm1282_vm8, %v1257_v63, %v2595_v21 }
 0x102   : > { %v791_v22 = vpop.permute.xlu1 %790  ;;  %v1323_v4 = vsel %vm1315_vm9, %v1290_v16, %v1057_v27 }
 0x103   : > { %v775_v61 = vpop.permute.xlu0 %774 }
 0x104   : > { %1078 = vrot.lane.b32.xlu1 %v2588_v54, %s2032_s12  ;;  %v1127_v52 = vsel %vm1117_vm3, %v2259_v44, %v775_v61 }
 0x105   : > { %1062 = vrot.lane.b32.xlu0 %v2156_v51, %s2032_s12 }
 0x106   : > { %v1108_v28 = vpop.permute.xlu1 %1107 }
 0x107   : > { %v1372_v54 = vsel %vm1348_vm10, %v1339_v31, %v1108_v28  ;;  %v1092_v36 = vpop.permute.xlu0 %1091 }
 0x108   : > { %1080 = vrot.lane.b32.xlu1 %v1049_v41, %s2032_s12  ;;  %1907 = vmatmul.mubr.msk.bf16.gmra.mrb[4].mxu1 %vm1408_vm11, %v1372_v54  ;;  %v1356_v17 = vsel %vm1348_vm10, %v1323_v4, %v1092_v36 }
 0x109   : > { %1064 = vrot.lane.b32.xlu0 %v2151_v48, %s2032_s12  ;;  %1891 = vmatmul.mubr.msk.bf16.gmra.mrb[4].mxu0 %vm1408_vm11, %v1356_v17 }
 0x10a   : > { %v793_v51 = vpop.permute.xlu1 %792 }
 0x10b   : > { %v777_v21 = vpop.permute.xlu0 %776  ;;  %v1145_v24 = vsel %vm1117_vm3, %v2294_v9, %v793_v51 }
 0x10c   : > { %1113 = vrot.lane.b32.xlu1 %v2599_v62, %s2033_s15  ;;  %v1129_v41 = vsel %vm1117_vm3, %v2299_v13, %v777_v21 }
 0x10d   : > { %1097 = vrot.lane.b32.xlu0 %v2118_v12, %s2033_s15 }
 0x10e   : > { %v872_v10 = vpop.permute.xlu1 %871 }
 0x10f   : > { %v856_v39 = vpop.permute.xlu0 %855 }
 0x110   : > { %1115 = vrot.lane.b32.xlu1 %v1084_v37, %s2033_s15  ;;  %v1160_v47 = vsel %vm1150_vm4, %v1127_v52, %v856_v39 }
 0x111   : > { %1099 = vrot.lane.b32.xlu0 %v2130_v23, %s2033_s15  ;;  %v1143_v23 = vsel %vm1117_vm3, %v2254_v43, %v791_v22 }
 0x112   : > { %v874_v48 = vpop.permute.xlu1 %873  ;;  %v1176_v34 = vsel %vm1150_vm4, %v1143_v23, %v872_v10 }
 0x113   : > { %v858_v57 = vpop.permute.xlu0 %857  ;;  %v1178_v26 = vsel %vm1150_vm4, %v1145_v24, %v874_v48 }
 0x114   : > { %v1162_v28 = vsel %vm1150_vm4, %v1129_v41, %v858_v57 }
 0x116   : > { %v909_v25 = vpop.permute.xlu1 %908 }
 0x117   : > { %v893_v1 = vpop.permute.xlu0 %892  ;;  %v1209_v50 = vsel %vm1183_vm6, %v1176_v34, %v909_v25 }
 0x118   : > { %v1193_v8 = vsel %vm1183_vm6, %v1160_v47, %v893_v1 }
 0x11a   : > { %v911_v32 = vpop.permute.xlu1 %910 }
 0x11b   : > { %v895_v33 = vpop.permute.xlu0 %894  ;;  %v1211_v63 = vsel %vm1183_vm6, %v1178_v26, %v911_v32 }
 0x11c   : > { %v1195_v16 = vsel %vm1183_vm6, %v1162_v28, %v895_v33 }
 0x11e   : > { %v956_v59 = vpop.permute.xlu1 %955 }
 0x11f   : > { %v940_v62 = vpop.permute.xlu0 %939  ;;  %v1242_v38 = vsel %vm1216_vm5, %v1209_v50, %v956_v59 }
 0x120   : > { %v1226_v43 = vsel %vm1216_vm5, %v1193_v8, %v940_v62 }
 0x122   : > { %v958_v27 = vpop.permute.xlu1 %957 }
 0x123   : > { %v942_v46 = vpop.permute.xlu0 %941  ;;  %v1244_v9 = vsel %vm1216_vm5, %v1211_v63, %v958_v27 }
 0x124   : > { %v1228_v36 = vsel %vm1216_vm5, %v1195_v16, %v942_v46 }
 0x126   : > { %v991_v19 = vpop.permute.xlu1 %990 }
 0x127   : > { %v975_v35 = vpop.permute.xlu0 %974  ;;  %v1275_v20 = vsel %vm1249_vm7, %v1242_v38, %v991_v19 }
 0x128   : > { %v1259_v15 = vsel %vm1249_vm7, %v1226_v43, %v975_v35 }
 0x12a   : > { %v993_v12 = vpop.permute.xlu1 %992 }
 0x12b   : > { %v977_v18 = vpop.permute.xlu0 %976  ;;  %v1277_v54 = vsel %vm1249_vm7, %v1244_v9, %v993_v12 }
 0x12c   : > { %v1261_v13 = vsel %vm1249_vm7, %v1228_v36, %v977_v18 }
 0x12e   : > { %v1028_v29 = vpop.permute.xlu1 %1027 }
 0x12f   : > { %v1012_v40 = vpop.permute.xlu0 %1011  ;;  %v1308_v11 = vsel %vm1282_vm8, %v1275_v20, %v1028_v29 }
 0x130   : > { %v1292_v49 = vsel %vm1282_vm8, %v1259_v15, %v1012_v40 }
 0x132   : > { %v1030_v0 = vpop.permute.xlu1 %1029 }
 0x133   : > { %v1014_v60 = vpop.permute.xlu0 %1013  ;;  %v1310_v17 = vsel %vm1282_vm8, %v1277_v54, %v1030_v0 }
 0x134   : > { %v1294_v51 = vsel %vm1282_vm8, %v1261_v13, %v1014_v60 }
 0x136   : > { %v1075_v6 = vpop.permute.xlu1 %1074 }
 0x137   : > { %v1059_v53 = vpop.permute.xlu0 %1058  ;;  %v1341_v44 = vsel %vm1315_vm9, %v1308_v11, %v1075_v6 }
 0x138   : > { %v1325_v14 = vsel %vm1315_vm9, %v1292_v49, %v1059_v53 }
 0x13a   : > { %v1077_v7 = vpop.permute.xlu1 %1076 }
 0x13b   : > { %v1061_v42 = vpop.permute.xlu0 %1060  ;;  %v1343_v55 = vsel %vm1315_vm9, %v1310_v17, %v1077_v7 }
 0x13c   : > { %v1327_v37 = vsel %vm1315_vm9, %v1294_v51, %v1061_v42 }
 0x13e   : > { %v1110_v22 = vpop.permute.xlu1 %1109 }
 0x13f   : > { %v1374_v2 = vsel %vm1348_vm10, %v1341_v44, %v1110_v22  ;;  %v1094_v61 = vpop.permute.xlu0 %1093 }
 0x140   : > { %1910 = vmatprep.mubr.msk.bf16.mxu1 %vm1408_vm11, %v1374_v2  ;;  %v1358_v5 = vsel %vm1348_vm10, %v1325_v14, %v1094_v61 }
 0x141   : > { %1894 = vmatprep.mubr.msk.bf16.mxu0 %vm1408_vm11, %v1358_v5 }
 0x142   : > { %v795_v31 = vpop.permute.xlu1 %794 }
 0x143   : > { %v779_v4 = vpop.permute.xlu0 %778  ;;  %v1147_v50 = vsel %vm1117_vm3, %v2366_v56, %v795_v31 }
 0x144   : > { %v1131_v38 = vsel %vm1117_vm3, %v2372_v58, %v779_v4 }
 0x146   : > { %v1112_v30 = vpop.permute.xlu1 %1111 }
 0x147   : > { %v1376_v21 = vsel %vm1348_vm10, %v1343_v55, %v1112_v30  ;;  %v1096_v10 = vpop.permute.xlu0 %1095 }
 0x148   : > { %1911 = vmatmul.mubr.msk.bf16.gmra.mrb[8].mxu1 %vm1408_vm11, %v1376_v21  ;;  %v1360_v39 = vsel %vm1348_vm10, %v1327_v37, %v1096_v10  ;;  %v2778_v10 = vld [vmem:[%s2894_s4] ss:$0 sm:$0xff] }
 0x149   : > { %1895 = vmatmul.mubr.msk.bf16.gmra.mrb[8].mxu0 %vm1408_vm11, %v1360_v39 }
 0x14a   : > { %v797_v48 = vpop.permute.xlu1 %796 }
 0x14b   : > { %v781_v57 = vpop.permute.xlu0 %780  ;;  %v1149_v11 = vsel %vm1117_vm3, %v2428_v3, %v797_v48 }
 0x14c   : > { %v1133_v2 = vsel %vm1117_vm3, %v2440_v45, %v781_v57 }
 0x14e   : > { %v876_v25 = vpop.permute.xlu1 %875 }
 0x14f   : > { %v860_v1 = vpop.permute.xlu0 %859  ;;  %v1180_v47 = vsel %vm1150_vm4, %v1147_v50, %v876_v25 }
 0x150   : > { %v1164_v42 = vsel %vm1150_vm4, %v1131_v38, %v860_v1 }
 0x152   : > { %v878_v32 = vpop.permute.xlu1 %877 }
 0x153   : > { %v862_v33 = vpop.permute.xlu0 %861  ;;  %v1182_v22 = vsel %vm1150_vm4, %v1149_v11, %v878_v32 }
 0x154   : > { %v1166_v26 = vsel %vm1150_vm4, %v1133_v2, %v862_v33 }
 0x156   : > { %v913_v59 = vpop.permute.xlu1 %912 }
 0x157   : > { %v897_v62 = vpop.permute.xlu0 %896  ;;  %v1213_v8 = vsel %vm1183_vm6, %v1180_v47, %v913_v59 }
 0x158   : > { %v1197_v15 = vsel %vm1183_vm6, %v1164_v42, %v897_v62 }
 0x15a   : > { %v915_v27 = vpop.permute.xlu1 %914 }
 0x15b   : > { %v899_v46 = vpop.permute.xlu0 %898  ;;  %v1215_v24 = vsel %vm1183_vm6, %v1182_v22, %v915_v27 }
 0x15c   : > { %v1199_v31 = vsel %vm1183_vm6, %v1166_v26, %v899_v46 }
 0x15e   : > { %v960_v19 = vpop.permute.xlu1 %959 }
 0x15f   : > { %v944_v35 = vpop.permute.xlu0 %943  ;;  %v1246_v43 = vsel %vm1216_vm5, %v1213_v8, %v960_v19 }
 0x160   : > { %v1230_v49 = vsel %vm1216_vm5, %v1197_v15, %v944_v35 }
 0x162   : > { %v962_v12 = vpop.permute.xlu1 %961 }
 0x163   : > { %v946_v18 = vpop.permute.xlu0 %945  ;;  %v1248_v5 = vsel %vm1216_vm5, %v1215_v24, %v962_v12 }
 0x164   : > { %v1232_v16 = vsel %vm1216_vm5, %v1199_v31, %v946_v18 }
 0x166   : > { %v995_v29 = vpop.permute.xlu1 %994 }
 0x167   : > { %v979_v40 = vpop.permute.xlu0 %978  ;;  %v1279_v56 = vsel %vm1249_vm7, %v1246_v43, %v995_v29 }
 0x168   : > { %v1263_v14 = vsel %vm1249_vm7, %v1230_v49, %v979_v40 }
 0x16a   : > { %v997_v0 = vpop.permute.xlu1 %996 }
 0x16b   : > { %v981_v60 = vpop.permute.xlu0 %980  ;;  %v1281_v28 = vsel %vm1249_vm7, %v1248_v5, %v997_v0 }
 0x16c   : > { %v1265_v36 = vsel %vm1249_vm7, %v1232_v16, %v981_v60 }
 0x16e   : > { %v1032_v6 = vpop.permute.xlu1 %1031 }
 0x16f   : > { %v1016_v23 = vpop.permute.xlu0 %1015  ;;  %v1312_v58 = vsel %vm1282_vm8, %v1279_v56, %v1032_v6 }
 0x170   : > { %v1296_v41 = vsel %vm1282_vm8, %v1263_v14, %v1016_v23 }
 0x172   : > { %v1034_v53 = vpop.permute.xlu1 %1033 }
 0x173   : > { %v1018_v34 = vpop.permute.xlu0 %1017  ;;  %v1314_v54 = vsel %vm1282_vm8, %v1281_v28, %v1034_v53 }
 0x174   : > { %v1298_v55 = vsel %vm1282_vm8, %v1265_v36, %v1018_v34 }
 0x176   : > { %v1079_v52 = vpop.permute.xlu1 %1078 }
 0x177   : > { %v1063_v7 = vpop.permute.xlu0 %1062  ;;  %v1345_v3 = vsel %vm1315_vm9, %v1312_v58, %v1079_v52 }
 0x178   : > { %v1329_v45 = vsel %vm1315_vm9, %v1296_v41, %v1063_v7 }
 0x17a   : > { %v1081_v20 = vpop.permute.xlu1 %1080 }
 0x17b   : > { %v1065_v44 = vpop.permute.xlu0 %1064  ;;  %v1347_v17 = vsel %vm1315_vm9, %v1314_v54, %v1081_v20 }
 0x17c   : > { %v1331_v51 = vsel %vm1315_vm9, %v1298_v55, %v1065_v44 }
 0x17e   : > { %v1114_v61 = vpop.permute.xlu1 %1113 }
 0x17f   : > { %v1378_v63 = vsel %vm1348_vm10, %v1345_v3, %v1114_v61  ;;  %v1098_v9 = vpop.permute.xlu0 %1097 }
 0x180   : > { %1914 = vmatprep.mubr.msk.bf16.mxu1 %vm1408_vm11, %v1378_v63  ;;  %v1362_v4 = vsel %vm1348_vm10, %v1329_v45, %v1098_v9 }
 0x181   : > { %1898 = vmatprep.mubr.msk.bf16.mxu0 %vm1408_vm11, %v1362_v4 }
 0x182   : > { %v1116_v13 = vpop.permute.xlu1 %1115 }
 0x183   : > { %v1380_v30 = vsel %vm1348_vm10, %v1347_v17, %v1116_v13  ;;  %v1100_v21 = vpop.permute.xlu0 %1099 }
 0x184   : > { %1915 = vmatmul.mubr.msk.bf16.gmra.mrb[12].mxu1 %vm1408_vm11, %v1380_v30  ;;  %v1364_v37 = vsel %vm1348_vm10, %v1331_v51, %v1100_v21 }
 0x185   : > { %1899 = vmatmul.mubr.msk.bf16.gmra.mrb[12].mxu0 %vm1408_vm11, %v1364_v37 }
 0x19b   : > { %v1904_v39 = vpop.f32.mrb[0].mxu1 }
 0x19c   : > { %v1552_v48 = vadd.f32 %v1904_v39, %v2778_v10  ;;  %v1543_v57 = vpop.f32.mrb[1].mxu1  ;;  %v1888_v25 = vpop.f32.mrb[0].mxu0 }
 0x19d   : > { %v1544_v1 = vadd.f32 %v2778_v10, %v1543_v57  ;;  %v1905_v32 = vpop.f32.mrb[2].mxu1  ;;  %v1488_v33 = vadd.f32 %v1888_v25, %v2778_v10  ;;  %v1479_v62 = vpop.f32.mrb[1].mxu0 }
 0x19e   : > { %v1624_v59 = vmax.f32 %v1552_v48, 0.0  ;;  %v1555_v27 = vadd.f32 %v1905_v32, %v2778_v10  ;;  %v1546_v46 = vpop.f32.mrb[3].mxu1  ;;  %v1480_v19 = vadd.f32 %v2778_v10, %v1479_v62  ;;  %v1889_v12 = vpop.f32.mrb[2].mxu0 }
 0x19f   : > { %v1622_v35 = vmax.f32 %v1544_v1, 0.0  ;;  %v1547_v18 = vadd.f32 %v2778_v10, %v1546_v46  ;;  %v1608_v29 = vmax.f32 %v1488_v33, 0.0  ;;  %v1491_v40 = vadd.f32 %v1889_v12, %v2778_v10  ;;  %v1482_v60 = vpop.f32.mrb[3].mxu0 }
 0x1a0   : > { %1656 = vst.msk [vmem:[%s2784_s6 + $0x90] sm:$0xff] %vm1150_vm4, %v1624_v59  ;;  %v1625_v0 = vmax.f32 %v1555_v27, 0.0  ;;  %v1606_v6 = vmax.f32 %v1480_v19, 0.0  ;;  %v1483_v23 = vadd.f32 %v2778_v10, %v1482_v60 }
 0x1a1   : > { %1654 = vst.msk [vmem:[%s2784_s6 + $0x80] sm:$0xff] %vm1150_vm4, %v1622_v35  ;;  %v1623_v53 = vmax.f32 %v1547_v18, 0.0  ;;  %1640 = vst.msk [vmem:[%s2784_s6 + $0x10] sm:$0xff] %vm1150_vm4, %v1608_v29  ;;  %v1609_v34 = vmax.f32 %v1491_v40, 0.0 }
 0x1a2   : > { %1657 = vst.msk [vmem:[%s2784_s6 + $0x98] sm:$0xff] %vm1150_vm4, %v1625_v0  ;;  %1638 = vst.msk [vmem:[%s2784_s6] sm:$0xff] %vm1150_vm4, %v1606_v6  ;;  %v1607_v52 = vmax.f32 %v1483_v23, 0.0 }
 0x1a3   : > { %1655 = vst.msk [vmem:[%s2784_s6 + $0x88] sm:$0xff] %vm1150_vm4, %v1623_v53  ;;  %1641 = vst.msk [vmem:[%s2784_s6 + $0x18] sm:$0xff] %vm1150_vm4, %v1609_v34 }
 0x1a4   : > { %1639 = vst.msk [vmem:[%s2784_s6 + $0x8] sm:$0xff] %vm1150_vm4, %v1607_v52 }
 0x1db   : > { %v1908_v50 = vpop.f32.mrb[4].mxu1 }
 0x1dc   : > { %v1568_v7 = vadd.f32 %v1908_v50, %v2778_v10  ;;  %v1559_v47 = vpop.f32.mrb[5].mxu1  ;;  %v1892_v38 = vpop.f32.mrb[4].mxu0 }
 0x1dd   : > { %v1560_v8 = vadd.f32 %v2778_v10, %v1559_v47  ;;  %v1909_v20 = vpop.f32.mrb[6].mxu1  ;;  %v1504_v42 = vadd.f32 %v1892_v38, %v2778_v10  ;;  %v1495_v11 = vpop.f32.mrb[5].mxu0 }
 0x1de   : > { %v1628_v43 = vmax.f32 %v1568_v7, 0.0  ;;  %v1571_v15 = vadd.f32 %v1909_v20, %v2778_v10  ;;  %v1562_v56 = vpop.f32.mrb[7].mxu1  ;;  %v1496_v44 = vadd.f32 %v2778_v10, %v1495_v11  ;;  %v1893_v49 = vpop.f32.mrb[6].mxu0 }
 0x1df   : > { %v1626_v22 = vmax.f32 %v1560_v8, 0.0  ;;  %v1563_v58 = vadd.f32 %v2778_v10, %v1562_v56  ;;  %v1612_v2 = vmax.f32 %v1504_v42, 0.0  ;;  %v1507_v24 = vadd.f32 %v1893_v49, %v2778_v10  ;;  %v1498_v3 = vpop.f32.mrb[7].mxu0 }
 0x1e0   : > { %1660 = vst.msk [vmem:[%s2784_s6 + $0xb0] sm:$0xff] %vm1150_vm4, %v1628_v43  ;;  %v1629_v14 = vmax.f32 %v1571_v15, 0.0  ;;  %v1610_v61 = vmax.f32 %v1496_v44, 0.0  ;;  %v1499_v26 = vadd.f32 %v2778_v10, %v1498_v3 }
 0x1e1   : > { %1658 = vst.msk [vmem:[%s2784_s6 + $0xa0] sm:$0xff] %vm1150_vm4, %v1626_v22  ;;  %v1627_v5 = vmax.f32 %v1563_v58, 0.0  ;;  %1644 = vst.msk [vmem:[%s2784_s6 + $0x30] sm:$0xff] %vm1150_vm4, %v1612_v2  ;;  %v1613_v41 = vmax.f32 %v1507_v24, 0.0 }
 0x1e2   : > { %1661 = vst.msk [vmem:[%s2784_s6 + $0xb8] sm:$0xff] %vm1150_vm4, %v1629_v14  ;;  %1642 = vst.msk [vmem:[%s2784_s6 + $0x20] sm:$0xff] %vm1150_vm4, %v1610_v61  ;;  %v1611_v63 = vmax.f32 %v1499_v26, 0.0 }
 0x1e3   : > { %1659 = vst.msk [vmem:[%s2784_s6 + $0xa8] sm:$0xff] %vm1150_vm4, %v1627_v5  ;;  %1645 = vst.msk [vmem:[%s2784_s6 + $0x38] sm:$0xff] %vm1150_vm4, %v1613_v41 }
 0x1e4   : > { %1643 = vst.msk [vmem:[%s2784_s6 + $0x28] sm:$0xff] %vm1150_vm4, %v1611_v63 }
 0x21b   : > { %v1912_v31 = vpop.f32.mrb[8].mxu1 }
 0x21c   : > { %v1584_v28 = vadd.f32 %v1912_v31, %v2778_v10  ;;  %v1575_v45 = vpop.f32.mrb[9].mxu1  ;;  %v1896_v9 = vpop.f32.mrb[8].mxu0 }
 0x21d   : > { %v1576_v16 = vadd.f32 %v2778_v10, %v1575_v45  ;;  %v1913_v54 = vpop.f32.mrb[10].mxu1  ;;  %v1520_v4 = vadd.f32 %v1896_v9, %v2778_v10  ;;  %v1511_v17 = vpop.f32.mrb[9].mxu0 }
 0x21e   : > { %v1632_v36 = vmax.f32 %v1584_v28, 0.0  ;;  %v1587_v13 = vadd.f32 %v1913_v54, %v2778_v10  ;;  %v1578_v55 = vpop.f32.mrb[11].mxu1  ;;  %v1512_v30 = vadd.f32 %v2778_v10, %v1511_v17  ;;  %v1897_v21 = vpop.f32.mrb[10].mxu0 }
 0x21f   : > { %v1630_v51 = vmax.f32 %v1576_v16, 0.0  ;;  %v1579_v37 = vadd.f32 %v2778_v10, %v1578_v55  ;;  %v1616_v39 = vmax.f32 %v1520_v4, 0.0  ;;  %v1523_v48 = vadd.f32 %v1897_v21, %v2778_v10  ;;  %v1514_v25 = vpop.f32.mrb[11].mxu0 }
 0x220   : > { %1664 = vst.msk [vmem:[%s2784_s6 + $0xd0] sm:$0xff] %vm1150_vm4, %v1632_v36  ;;  %v1633_v57 = vmax.f32 %v1587_v13, 0.0  ;;  %v1614_v1 = vmax.f32 %v1512_v30, 0.0  ;;  %v1515_v32 = vadd.f32 %v2778_v10, %v1514_v25 }
 0x221   : > { %1662 = vst.msk [vmem:[%s2784_s6 + $0xc0] sm:$0xff] %vm1150_vm4, %v1630_v51  ;;  %v1631_v33 = vmax.f32 %v1579_v37, 0.0  ;;  %1648 = vst.msk [vmem:[%s2784_s6 + $0x50] sm:$0xff] %vm1150_vm4, %v1616_v39  ;;  %v1617_v59 = vmax.f32 %v1523_v48, 0.0 }
 0x222   : > { %1665 = vst.msk [vmem:[%s2784_s6 + $0xd8] sm:$0xff] %vm1150_vm4, %v1633_v57  ;;  %1646 = vst.msk [vmem:[%s2784_s6 + $0x40] sm:$0xff] %vm1150_vm4, %v1614_v1  ;;  %v1615_v62 = vmax.f32 %v1515_v32, 0.0 }
 0x223   : > { %1663 = vst.msk [vmem:[%s2784_s6 + $0xc8] sm:$0xff] %vm1150_vm4, %v1631_v33  ;;  %1649 = vst.msk [vmem:[%s2784_s6 + $0x58] sm:$0xff] %vm1150_vm4, %v1617_v59 }
 0x224   : > { %1647 = vst.msk [vmem:[%s2784_s6 + $0x48] sm:$0xff] %vm1150_vm4, %v1615_v62 }
 0x257   : > { %v1916_v27 = vpop.f32.mrb[12].mxu1 }
 0x258   : > { %v1600_v46 = vadd.f32 %v1916_v27, %v2778_v10  ;;  %v1591_v19 = vpop.f32.mrb[13].mxu1  ;;  %v1900_v35 = vpop.f32.mrb[12].mxu0 }
 0x259   : > { %v1592_v12 = vadd.f32 %v2778_v10, %v1591_v19  ;;  %v1917_v18 = vpop.f32.mrb[14].mxu1  ;;  %v1536_v29 = vadd.f32 %v1900_v35, %v2778_v10  ;;  %v1527_v0 = vpop.f32.mrb[13].mxu0 }
 0x25a   : > { %v1636_v40 = vmax.f32 %v1600_v46, 0.0  ;;  %v1603_v60 = vadd.f32 %v1917_v18, %v2778_v10  ;;  %v1594_v6 = vpop.f32.mrb[15].mxu1  ;;  %v1528_v23 = vadd.f32 %v2778_v10, %v1527_v0  ;;  %v1901_v34 = vpop.f32.mrb[14].mxu0 }
 0x25b   : > { %v1634_v53 = vmax.f32 %v1592_v12, 0.0  ;;  %v1595_v52 = vadd.f32 %v2778_v10, %v1594_v6  ;;  %v1620_v50 = vmax.f32 %v1536_v29, 0.0  ;;  %v1539_v7 = vadd.f32 %v1901_v34, %v2778_v10  ;;  %v1530_v38 = vpop.f32.mrb[15].mxu0 }
 0x25c   : > { %1668 = vst.msk [vmem:[%s2784_s6 + $0xf0] sm:$0xff] %vm1150_vm4, %v1636_v40  ;;  %v1637_v47 = vmax.f32 %v1603_v60, 0.0  ;;  %v1618_v8 = vmax.f32 %v1528_v23, 0.0  ;;  %v1531_v20 = vadd.f32 %v2778_v10, %v1530_v38 }
 0x25d   : > { %1666 = vst.msk [vmem:[%s2784_s6 + $0xe0] sm:$0xff] %vm1150_vm4, %v1634_v53  ;;  %v1635_v42 = vmax.f32 %v1595_v52, 0.0  ;;  %1652 = vst.msk [vmem:[%s2784_s6 + $0x70] sm:$0xff] %vm1150_vm4, %v1620_v50  ;;  %v1621_v43 = vmax.f32 %v1539_v7, 0.0 }
 0x25e   : > { %1669 = vst.msk [vmem:[%s2784_s6 + $0xf8] sm:$0xff] %vm1150_vm4, %v1637_v47  ;;  %1650 = vst.msk [vmem:[%s2784_s6 + $0x60] sm:$0xff] %vm1150_vm4, %v1618_v8  ;;  %v1619_v11 = vmax.f32 %v1531_v20, 0.0 }
 0x25f   : > { %1667 = vst.msk [vmem:[%s2784_s6 + $0xe8] sm:$0xff] %vm1150_vm4, %v1635_v42  ;;  %1653 = vst.msk [vmem:[%s2784_s6 + $0x78] sm:$0xff] %vm1150_vm4, %v1621_v43 }
 0x260   : > { %1651 = vst.msk [vmem:[%s2784_s6 + $0x68] sm:$0xff] %vm1150_vm4, %v1619_v11 }
 0x261 PF: > { %s15_s20 = sadd.s32 1, %s2024_s20   ;;  %s2896_s18 = smov %s2020_s19 }
 0x262   : > { %p12_p6 = scmp.ge.s32.totalorder %s15_s20, 4   ;;  %s2897_s19 = smov %s2899_s21 }
 0x264   :  { %14 = sbr.rel (!%p12_p6) target bundleno = 2 (0x2), region = 76 }

</bundles_post_ra>
